<compile_context>
chip_gen: v7x
topology: tpu7x:2x2x1
jax: 0.10.0
libtpu: 0.0.40
codegen_flags: <defaults>
</compile_context>

<pallas_src>
import math

import jax
import jax.numpy as jnp
from jax.experimental import pallas as pl
from jax.experimental.pallas import tpu as pltpu


# -----------------------------------------------------------------------------
# Pass 1: masked cumulative sums + optional normalize (all batches, one step).
# -----------------------------------------------------------------------------
def _make_embed_kernel(normalize, scale, batch):
    def kernel(nm_ref, lh_ref, uw_ref, out_ref):
        lh = lh_ref[...]                                       # (H, H) bf16
        uw = uw_ref[...]                                       # (W, W) bf16
        # `batch` is static and small; a static loop keeps all ref indexing
        # static and lowers to B pairs of thin MXU matmuls inside one step.
        for b in range(batch):
            # 0/1 mask -> bf16 cast + f32 accumulation is an exact cumsum.
            nm = nm_ref[b].astype(jnp.bfloat16)                # (H, W)
            # cumsum over H (torch dim 1): L @ nm, L[i, k] = 1 if k <= i
            y_embed = jnp.dot(lh, nm, preferred_element_type=jnp.float32)
            # cumsum over W (torch dim 2): nm @ U, U[k, j] = 1 if k <= j
            x_embed = jnp.dot(nm, uw, preferred_element_type=jnp.float32)

            if normalize:
                eps = 1e-06
                y_embed = (y_embed - 0.5) / (y_embed[-1:, :] + eps) * scale
                x_embed = (x_embed - 0.5) / (x_embed[:, -1:] + eps) * scale

            out_ref[b, 0] = y_embed                            # (H, W)
            out_ref[b, 1] = x_embed                            # (H, W)

    return kernel


# -----------------------------------------------------------------------------
# Pass 2: channel expansion (one sin per output element, channel-major).
# -----------------------------------------------------------------------------
def _expand_kernel(emb_ref, inv_ref, phase_ref, out_ref):
    F = inv_ref.shape[0]
    inv = inv_ref[...]                                         # (F, 1)
    phase = phase_ref[...]                                     # (F, 1)
    y = emb_ref[0, 0:1, :]                                     # (1, T)
    x = emb_ref[0, 1:2, :]                                     # (1, T)
    # cos(v) == sin(v + pi/2): phase encodes the even/odd interleave, and
    # dim_t[2k] == dim_t[2k+1] so inv_dim_t is simply per output channel.
    out_ref[0, :F, :] = jnp.sin(y * inv + phase)               # pos_y (F, T)
    out_ref[0, F:, :] = jnp.sin(x * inv + phase)               # pos_x (F, T)


# -----------------------------------------------------------------------------
# Wrapper
# -----------------------------------------------------------------------------
def position_embedding_sine(not_mask, *, num_pos_feats=64, temperature=10000,
                            normalize=False, scale=None, hw_tile=8192):
    """not_mask: (B, H, W) 0/1 values.  Returns (B, 2*num_pos_feats, H, W) f32."""
    if scale is not None and normalize is False:
        raise ValueError("normalize should be True if scale is passed")
    if scale is None:
        scale = 2 * math.pi

    B, H, W = not_mask.shape
    F = num_pos_feats
    HW = H * W

    # Resident constants (constant index_maps -> stay in VMEM across steps).
    lh = (jnp.arange(H)[:, None] >= jnp.arange(H)[None, :]).astype(jnp.bfloat16)
    uw = (jnp.arange(W)[:, None] <= jnp.arange(W)[None, :]).astype(jnp.bfloat16)

    ch = jnp.arange(F, dtype=jnp.float32)
    expo = 2.0 * jnp.floor(ch * 0.5) / float(F)
    inv_dim_t = jnp.exp(-math.log(float(temperature)) * expo).reshape(F, 1)
    phase = ((jnp.arange(F) % 2).astype(jnp.float32) * (math.pi / 2.0)).reshape(F, 1)

    # --- pass 1: cumsums + normalize -> (B, 2, H, W), single grid step --------
    embeds = pl.pallas_call(
        _make_embed_kernel(normalize, scale, B),
        out_shape=jax.ShapeDtypeStruct((B, 2, H, W), jnp.float32),
        grid_spec=pltpu.PrefetchScalarGridSpec(
            num_scalar_prefetch=0,
            grid=(1,),
            in_specs=[pl.BlockSpec((B, H, W), lambda i: (0, 0, 0)),
                      pl.BlockSpec((H, H), lambda i: (0, 0)),
                      pl.BlockSpec((W, W), lambda i: (0, 0))],
            out_specs=pl.BlockSpec((B, 2, H, W), lambda i: (0, 0, 0, 0)),
        ),
        compiler_params=pltpu.CompilerParams(
            dimension_semantics=("arbitrary",)),
    )(not_mask, lh, uw)

    # Free row-major collapse (no data movement).
    embeds_flat = embeds.reshape(B, 2, HW)

    # --- pass 2 tile size ------------------------------------------------------
    # Output block is (2F, t) f32 and is double-buffered; keep 2 * (2F*t*4) B
    # under ~12 MiB so the default scoped-VMEM limit is safe on every
    # generation (v5e 16 MiB, v6e/v7x 32 MiB scoped; v7x has only 64 MiB
    # physical).  hw_tile and the cap are kept multiples of 128 so stores stay
    # lane-dense (unmasked vst).
    vmem_budget = 12 * 1024 * 1024
    t_cap = max(128, (vmem_budget // (16 * F)) // 128 * 128)
    hw_tile = max(128, (min(hw_tile, t_cap) // 128) * 128)

    if HW % 128 == 0:
        t = min(hw_tile, HW)
    elif HW > 128:
        # 128-aligned tiles; only the final (partial) tail block uses masked
        # stores, instead of masking every store with a non-aligned block.
        t = min(hw_tile, (HW // 128) * 128)
    else:
        t = HW          # tiny map: a single block equal to the full axis

    # v7x has two TensorCores: when B == 1 a single-step parallel grid would
    # idle one of them, so force the HW axis into >= 2 tiles.
    if B == 1 and t == HW and HW >= 256:
        t = max(128, ((HW // 2 + 127) // 128) * 128)

    nt = pl.cdiv(HW, t)

    # --- pass 2: channel expansion, lane-dense (B, 2F, HW) ---------------------
    out_flat = pl.pallas_call(
        _expand_kernel,
        out_shape=jax.ShapeDtypeStruct((B, 2 * F, HW), jnp.float32),
        grid_spec=pltpu.PrefetchScalarGridSpec(
            num_scalar_prefetch=0,
            grid=(B, nt),
            in_specs=[pl.BlockSpec((1, 2, t), lambda b, i: (b, 0, i)),
                      pl.BlockSpec((F, 1), lambda b, i: (0, 0)),
                      pl.BlockSpec((F, 1), lambda b, i: (0, 0))],
            out_specs=pl.BlockSpec((1, 2 * F, t), lambda b, i: (b, 0, i)),
        ),
        compiler_params=pltpu.CompilerParams(
            dimension_semantics=("parallel", "parallel")),
    )(embeds_flat, inv_dim_t, phase)

    # Free row-major split -> NCHW, exactly matching the PyTorch module.
    return out_flat.reshape(B, 2 * F, H, W)


# -----------------------------------------------------------------------------
# Pure-JAX reference mirroring the PyTorch forward.
# -----------------------------------------------------------------------------
def _reference(not_mask, *, num_pos_feats=64, temperature=10000,
               normalize=False, scale=None):
    if scale is None:
        scale = 2 * math.pi
    nm = not_mask.astype(jnp.float32)
    y_embed = jnp.cumsum(nm, axis=1)
    x_embed = jnp.cumsum(nm, axis=2)
    if normalize:
        eps = 1e-06
        y_embed = (y_embed - 0.5) / (y_embed[:, -1:, :] + eps) * scale
        x_embed = (x_embed - 0.5) / (x_embed[:, :, -1:] + eps) * scale
    dim_t = jnp.arange(num_pos_feats, dtype=jnp.float32)
    dim_t = temperature ** (2 * (dim_t // 2) / num_pos_feats)
    pos_x = x_embed[:, :, :, None] / dim_t
    pos_y = y_embed[:, :, :, None] / dim_t
    pos_x = jnp.stack((jnp.sin(pos_x[:, :, :, 0::2]),
                       jnp.cos(pos_x[:, :, :, 1::2])), axis=4).reshape(*pos_x.shape[:3], -1)
    pos_y = jnp.stack((jnp.sin(pos_y[:, :, :, 0::2]),
                       jnp.cos(pos_y[:, :, :, 1::2])), axis=4).reshape(*pos_y.shape[:3], -1)
    pos = jnp.concatenate((pos_y, pos_x), axis=3)
    return jnp.transpose(pos, (0, 3, 1, 2))


if __name__ == "__main__":
    B, H, W = 2, 16, 16
    num_pos_feats = 64          # -> 128 output channels, module default

    key = jax.random.PRNGKey(0)
    not_mask = (jax.random.uniform(key, (B, H, W)) > 0.2).astype(jnp.float32)

    out = position_embedding_sine(not_mask, num_pos_feats=num_pos_feats,
                                  temperature=10000, normalize=True)
    out = jax.block_until_ready(out)

    ref = _reference(not_mask, num_pos_feats=num_pos_feats,
                     temperature=10000, normalize=True)
    assert out.shape == (B, 2 * num_pos_feats, H, W)
    assert jnp.allclose(out, ref, rtol=1e-4, atol=1e-4), "mismatch vs reference"

    print("KERNEL_OK")
</pallas_src>

<mosaic_0001>
module attributes {stable_mosaic.version = 11 : i64} {
  func.func @kernel(%arg0: i32, %arg1: memref<2x16x16xf32, #tpu.memory_space<vmem>>, %arg2: memref<16x16xbf16, #tpu.memory_space<vmem>>, %arg3: memref<16x16xbf16, #tpu.memory_space<vmem>>, %arg4: memref<2x2x16x16xf32, #tpu.memory_space<vmem>>) attributes {dimension_semantics = [#tpu.dimension_semantics<arbitrary>], iteration_bounds = array<i64: 1>, scalar_prefetch = 0 : i64, scratch_operands = 0 : i64, tpu.core_type = #tpu.core_type<tc>, window_params = [{pipeline_mode = #tpu.pipeline_mode<synchronous>, transform_indices = @transform_0, window_bounds = array<i64: 2, 16, 16>}, {pipeline_mode = #tpu.pipeline_mode<synchronous>, transform_indices = @transform_1, window_bounds = array<i64: 16, 16>}, {pipeline_mode = #tpu.pipeline_mode<synchronous>, transform_indices = @transform_2, window_bounds = array<i64: 16, 16>}, {pipeline_mode = #tpu.pipeline_mode<synchronous>, transform_indices = @transform_3, window_bounds = array<i64: 2, 2, 16, 16>}]} {
    %c0 = arith.constant 0 : index
    %c0_0 = arith.constant 0 : index
    %0 = vector.load %arg2[%c0, %c0_0] : memref<16x16xbf16, #tpu.memory_space<vmem>>, vector<16x16xbf16>
    %c0_1 = arith.constant 0 : index
    %c0_2 = arith.constant 0 : index
    %1 = vector.load %arg3[%c0_1, %c0_2] : memref<16x16xbf16, #tpu.memory_space<vmem>>, vector<16x16xbf16>
    %c0_3 = arith.constant 0 : index
    %c0_4 = arith.constant 0 : index
    %c0_5 = arith.constant 0 : index
    %2 = vector.load %arg1[%c0_3, %c0_4, %c0_5] : memref<2x16x16xf32, #tpu.memory_space<vmem>>, vector<1x16x16xf32>
    %3 = vector.shape_cast %2 : vector<1x16x16xf32> to vector<16x16xf32>
    %4 = arith.truncf %3 : vector<16x16xf32> to vector<16x16xbf16>
    %cst = arith.constant dense<0.000000e+00> : vector<16x16xf32>
    %5 = tpu.matmul %0, %4, %cst {dimension_numbers = #tpu.dot_dimension_numbers<[1], [0], [0], [1], [0, 0, 1, 1], [], []>} : vector<16x16xbf16>, vector<16x16xbf16>, vector<16x16xf32> -> vector<16x16xf32>
    %cst_6 = arith.constant dense<0.000000e+00> : vector<16x16xf32>
    %6 = tpu.matmul %4, %1, %cst_6 {dimension_numbers = #tpu.dot_dimension_numbers<[1], [0], [0], [1], [0, 0, 1, 1], [], []>} : vector<16x16xbf16>, vector<16x16xbf16>, vector<16x16xf32> -> vector<16x16xf32>
    %cst_7 = arith.constant 5.000000e-01 : f32
    %7 = vector.broadcast %cst_7 : f32 to vector<16x16xf32>
    %8 = arith.subf %5, %7 : vector<16x16xf32>
    %9 = vector.extract_strided_slice %5 {offsets = [15, 0], sizes = [1, 16], strides = [1, 1]} : vector<16x16xf32> to vector<1x16xf32>
    %cst_8 = arith.constant 9.99999997E-7 : f32
    %10 = vector.broadcast %cst_8 : f32 to vector<1x16xf32>
    %11 = arith.addf %9, %10 : vector<1x16xf32>
    %12 = vector.broadcast %11 : vector<1x16xf32> to vector<16x16xf32>
    %13 = arith.divf %8, %12 : vector<16x16xf32>
    %cst_9 = arith.constant 6.28318548 : f32
    %14 = vector.broadcast %cst_9 : f32 to vector<16x16xf32>
    %15 = arith.mulf %13, %14 : vector<16x16xf32>
    %cst_10 = arith.constant 5.000000e-01 : f32
    %16 = vector.broadcast %cst_10 : f32 to vector<16x16xf32>
    %17 = arith.subf %6, %16 : vector<16x16xf32>
    %18 = vector.extract_strided_slice %6 {offsets = [0, 15], sizes = [16, 1], strides = [1, 1]} : vector<16x16xf32> to vector<16x1xf32>
    %cst_11 = arith.constant 9.99999997E-7 : f32
    %19 = vector.broadcast %cst_11 : f32 to vector<16x1xf32>
    %20 = arith.addf %18, %19 : vector<16x1xf32>
    %21 = vector.broadcast %20 : vector<16x1xf32> to vector<16x16xf32>
    %22 = arith.divf %17, %21 : vector<16x16xf32>
    %cst_12 = arith.constant 6.28318548 : f32
    %23 = vector.broadcast %cst_12 : f32 to vector<16x16xf32>
    %24 = arith.mulf %22, %23 : vector<16x16xf32>
    %c0_13 = arith.constant 0 : index
    %c0_14 = arith.constant 0 : index
    %c0_15 = arith.constant 0 : index
    %c0_16 = arith.constant 0 : index
    %25 = vector.load %arg4[%c0_13, %c0_14, %c0_15, %c0_16] : memref<2x2x16x16xf32, #tpu.memory_space<vmem>>, vector<1x1x16x16xf32>
    %26 = vector.shape_cast %25 : vector<1x1x16x16xf32> to vector<16x16xf32>
    %27 = vector.shape_cast %15 : vector<16x16xf32> to vector<1x1x16x16xf32>
    tpu.vector_store %arg4[%c0_13, %c0_14, %c0_15, %c0_16], %27 {strides = array<i32>} : memref<2x2x16x16xf32, #tpu.memory_space<vmem>>, vector<1x1x16x16xf32>,
    %c0_17 = arith.constant 0 : index
    %c1 = arith.constant 1 : index
    %c0_18 = arith.constant 0 : index
    %c0_19 = arith.constant 0 : index
    %28 = vector.load %arg4[%c0_17, %c1, %c0_18, %c0_19] : memref<2x2x16x16xf32, #tpu.memory_space<vmem>>, vector<1x1x16x16xf32>
    %29 = vector.shape_cast %28 : vector<1x1x16x16xf32> to vector<16x16xf32>
    %30 = vector.shape_cast %24 : vector<16x16xf32> to vector<1x1x16x16xf32>
    tpu.vector_store %arg4[%c0_17, %c1, %c0_18, %c0_19], %30 {strides = array<i32>} : memref<2x2x16x16xf32, #tpu.memory_space<vmem>>, vector<1x1x16x16xf32>,
    %c1_20 = arith.constant 1 : index
    %c0_21 = arith.constant 0 : index
    %c0_22 = arith.constant 0 : index
    %31 = vector.load %arg1[%c1_20, %c0_21, %c0_22] : memref<2x16x16xf32, #tpu.memory_space<vmem>>, vector<1x16x16xf32>
    %32 = vector.shape_cast %31 : vector<1x16x16xf32> to vector<16x16xf32>
    %33 = arith.truncf %32 : vector<16x16xf32> to vector<16x16xbf16>
    %cst_23 = arith.constant dense<0.000000e+00> : vector<16x16xf32>
    %34 = tpu.matmul %0, %33, %cst_23 {dimension_numbers = #tpu.dot_dimension_numbers<[1], [0], [0], [1], [0, 0, 1, 1], [], []>} : vector<16x16xbf16>, vector<16x16xbf16>, vector<16x16xf32> -> vector<16x16xf32>
    %cst_24 = arith.constant dense<0.000000e+00> : vector<16x16xf32>
    %35 = tpu.matmul %33, %1, %cst_24 {dimension_numbers = #tpu.dot_dimension_numbers<[1], [0], [0], [1], [0, 0, 1, 1], [], []>} : vector<16x16xbf16>, vector<16x16xbf16>, vector<16x16xf32> -> vector<16x16xf32>
    %cst_25 = arith.constant 5.000000e-01 : f32
    %36 = vector.broadcast %cst_25 : f32 to vector<16x16xf32>
    %37 = arith.subf %34, %36 : vector<16x16xf32>
    %38 = vector.extract_strided_slice %34 {offsets = [15, 0], sizes = [1, 16], strides = [1, 1]} : vector<16x16xf32> to vector<1x16xf32>
    %cst_26 = arith.constant 9.99999997E-7 : f32
    %39 = vector.broadcast %cst_26 : f32 to vector<1x16xf32>
    %40 = arith.addf %38, %39 : vector<1x16xf32>
    %41 = vector.broadcast %40 : vector<1x16xf32> to vector<16x16xf32>
    %42 = arith.divf %37, %41 : vector<16x16xf32>
    %cst_27 = arith.constant 6.28318548 : f32
    %43 = vector.broadcast %cst_27 : f32 to vector<16x16xf32>
    %44 = arith.mulf %42, %43 : vector<16x16xf32>
    %cst_28 = arith.constant 5.000000e-01 : f32
    %45 = vector.broadcast %cst_28 : f32 to vector<16x16xf32>
    %46 = arith.subf %35, %45 : vector<16x16xf32>
    %47 = vector.extract_strided_slice %35 {offsets = [0, 15], sizes = [16, 1], strides = [1, 1]} : vector<16x16xf32> to vector<16x1xf32>
    %cst_29 = arith.constant 9.99999997E-7 : f32
    %48 = vector.broadcast %cst_29 : f32 to vector<16x1xf32>
    %49 = arith.addf %47, %48 : vector<16x1xf32>
    %50 = vector.broadcast %49 : vector<16x1xf32> to vector<16x16xf32>
    %51 = arith.divf %46, %50 : vector<16x16xf32>
    %cst_30 = arith.constant 6.28318548 : f32
    %52 = vector.broadcast %cst_30 : f32 to vector<16x16xf32>
    %53 = arith.mulf %51, %52 : vector<16x16xf32>
    %c1_31 = arith.constant 1 : index
    %c0_32 = arith.constant 0 : index
    %c0_33 = arith.constant 0 : index
    %c0_34 = arith.constant 0 : index
    %54 = vector.load %arg4[%c1_31, %c0_32, %c0_33, %c0_34] : memref<2x2x16x16xf32, #tpu.memory_space<vmem>>, vector<1x1x16x16xf32>
    %55 = vector.shape_cast %54 : vector<1x1x16x16xf32> to vector<16x16xf32>
    %56 = vector.shape_cast %44 : vector<16x16xf32> to vector<1x1x16x16xf32>
    tpu.vector_store %arg4[%c1_31, %c0_32, %c0_33, %c0_34], %56 {strides = array<i32>} : memref<2x2x16x16xf32, #tpu.memory_space<vmem>>, vector<1x1x16x16xf32>,
    %c1_35 = arith.constant 1 : index
    %c1_36 = arith.constant 1 : index
    %c0_37 = arith.constant 0 : index
    %c0_38 = arith.constant 0 : index
    %57 = vector.load %arg4[%c1_35, %c1_36, %c0_37, %c0_38] : memref<2x2x16x16xf32, #tpu.memory_space<vmem>>, vector<1x1x16x16xf32>
    %58 = vector.shape_cast %57 : vector<1x1x16x16xf32> to vector<16x16xf32>
    %59 = vector.shape_cast %53 : vector<16x16xf32> to vector<1x1x16x16xf32>
    tpu.vector_store %arg4[%c1_35, %c1_36, %c0_37, %c0_38], %59 {strides = array<i32>} : memref<2x2x16x16xf32, #tpu.memory_space<vmem>>, vector<1x1x16x16xf32>,
    return
  }
  func.func @transform_0(%arg0: i32) -> (i32, i32, i32) {
    %c0_i32 = arith.constant 0 : i32
    %c0_i32_0 = arith.constant 0 : i32
    %c0_i32_1 = arith.constant 0 : i32
    %c0_i32_2 = arith.constant 0 : i32
    return %c0_i32, %c0_i32_0, %c0_i32_1 : i32, i32, i32
  }
  func.func @transform_1(%arg0: i32) -> (i32, i32) {
    %c0_i32 = arith.constant 0 : i32
    %c0_i32_0 = arith.constant 0 : i32
    %c0_i32_1 = arith.constant 0 : i32
    return %c0_i32, %c0_i32_0 : i32, i32
  }
  func.func @transform_2(%arg0: i32) -> (i32, i32) {
    %c0_i32 = arith.constant 0 : i32
    %c0_i32_0 = arith.constant 0 : i32
    %c0_i32_1 = arith.constant 0 : i32
    return %c0_i32, %c0_i32_0 : i32, i32
  }
  func.func @transform_3(%arg0: i32) -> (i32, i32, i32, i32) {
    %c0_i32 = arith.constant 0 : i32
    %c0_i32_0 = arith.constant 0 : i32
    %c0_i32_1 = arith.constant 0 : i32
    %c0_i32_2 = arith.constant 0 : i32
    %c0_i32_3 = arith.constant 0 : i32
    return %c0_i32, %c0_i32_0, %c0_i32_1, %c0_i32_2 : i32, i32, i32, i32
  }
}

</mosaic_0001>

<bundles_post_ra>
// kernel: tpu_custom_call.1
= control target key start
LH: loop header
LB: loop body
LE: loop exit
PB: predicated region body
PF: predicated region fallthrough
CT: control target
= control target key end

     0   :  { %8 = vsyncpa [#allocation3], 0  ;;  %s620_s0 = inlined_call_operand.hbm [shape: f32[2,16,16], index: 0, kind: input, shape index: {}]   ;;  %s621_s1 = inlined_call_operand.hbm [shape: bf16[16,16], index: 1, kind: input, shape index: {}]   ;;  %s622_s2 = inlined_call_operand.hbm [shape: bf16[16,16], index: 2, kind: input, shape index: {}]   ;;  %s623_s3 = inlined_call_operand.hbm [shape: f32[2,2,16,16], index: 3, kind: output, shape index: {}]  }
   0x1   :  { %9 = vsyncpa [#allocation6], 0 }
   0x2   :  { %10 = vsyncpa [#allocation4], 0  ;;  %s513_s12 = smov [#allocation5]   ;;  %s419_s16 = scalar_lea.hbm %s621_s1, 128 }
   0x3   :  { %s28_s13 = sshll.u32 %s513_s12, 4  ;;  %p420_p0 = scmp.ne.s32.totalorder %s621_s1, %s419_s16  ;;  %s29_s13 = int_to_ptr.vmem [resolvable:$true] %s28_s13 }
   0x4   :  { %p423_p1 = scmp.lt.u32.totalorder %s419_s16, %s621_s1 }
   0x6   :  { %p425_p2 = pnand %p423_p1, %p420_p0 }
   0x8   :  { %428 = shalt.err (!%p425_p2)
}
   0x9   :  { %s429_s21 = scalar_lea.vmem %s29_s13, 128  ;;  %p434_p4 = scmp.lt.s32.totalorder %s29_s13, %s29_s13 }
   0xa   :  { %p430_p3 = scmp.ne.s32.totalorder %s29_s13, %s429_s21  ;;  %p435_p5 = scmp.lt.s32.totalorder %s429_s21, %s429_s21 }
   0xc   :  { %p436_p6 = por %p435_p5, %p434_p4 }
   0xe   :  { %p437_p7 = pnand %p436_p6, %p430_p3 }
  0x10   :  { %440 = shalt.err (!%p437_p7)
}
  0x11   :  { %s514_s22 = smov 64   ;;  %s515_s23 = smov 4  }
  0x12   :  { %34 = dma.hbm_to_vmem [thread:$0]  %s621_s1, 128, %s29_s13, [#allocation6], %s514_s22, %s514_s22, %s515_s23  }
  0x13   :  { %s516_s26 = smov [#allocation2]   ;;  %s441_s30 = scalar_lea.hbm %s620_s0, 512 }
  0x14   :  { %s16_s27 = sshll.u32 %s516_s26, 4  ;;  %p442_p8 = scmp.ne.s32.totalorder %s620_s0, %s441_s30  ;;  %s17_s27 = int_to_ptr.vmem [resolvable:$true] %s16_s27 }
  0x15   :  { %p445_p9 = scmp.lt.u32.totalorder %s441_s30, %s620_s0 }
  0x17   :  { %p447_p10 = pnand %p445_p9, %p442_p8 }
  0x19   :  { %450 = shalt.err (!%p447_p10)
}
  0x1a   :  { %s451_s8 = scalar_lea.vmem %s17_s27, 512  ;;  %p456_p12 = scmp.lt.s32.totalorder %s17_s27, %s17_s27 }
  0x1b   :  { %p452_p11 = scmp.ne.s32.totalorder %s17_s27, %s451_s8  ;;  %p457_p13 = scmp.lt.s32.totalorder %s451_s8, %s451_s8 }
  0x1d   :  { %p458_p0 = por %p457_p13, %p456_p12 }
  0x1f   :  { %p459_p1 = pnand %p458_p0, %p452_p11 }
  0x21   :  { %462 = shalt.err (!%p459_p1)
}
  0x22   :  { %s517_s1 = smov 128   ;;  %s518_s9 = smov 8  }
  0x23   :  { %22 = dma.hbm_to_vmem [thread:$0]  %s620_s0, 512, %s17_s27, [#allocation3], %s517_s1, %s517_s1, %s518_s9  }
  0x24   :  { %s519_s12 = smov [#allocation7]   ;;  %s463_s16 = scalar_lea.hbm %s622_s2, 128 }
  0x25   :  { %s40_s13 = sshll.u32 %s519_s12, 4  ;;  %p464_p2 = scmp.ne.s32.totalorder %s622_s2, %s463_s16  ;;  %s41_s13 = int_to_ptr.vmem [resolvable:$true] %s40_s13 }
  0x26   :  { %p467_p3 = scmp.lt.u32.totalorder %s463_s16, %s622_s2 }
  0x28   :  { %p469_p4 = pnand %p467_p3, %p464_p2 }
  0x2a   :  { %472 = shalt.err (!%p469_p4)
}
  0x2b   :  { %s473_s21 = scalar_lea.vmem %s41_s13, 128  ;;  %p478_p6 = scmp.lt.s32.totalorder %s41_s13, %s41_s13 }
  0x2c   :  { %p474_p5 = scmp.ne.s32.totalorder %s41_s13, %s473_s21  ;;  %p479_p7 = scmp.lt.s32.totalorder %s473_s21, %s473_s21 }
  0x2e   :  { %p480_p8 = por %p479_p7, %p478_p6 }
  0x30   :  { %p481_p9 = pnand %p480_p8, %p474_p5 }
  0x32   :  { %484 = shalt.err (!%p481_p9)
}
  0x33   :  { %46 = dma.hbm_to_vmem [thread:$0]  %s622_s2, 128, %s41_s13, [#allocation6], %s514_s22, %s514_s22, %s515_s23  }
  0x34   :  { %507 = dma.done.wait [#allocation3], 512  }
  0x35   :  { %508 = vsyncadd [#allocation3], 4294966784 }
  0x36   :  { %509 = dma.done.wait [#allocation6], 256  }
  0x37   :  { %510 = vsyncadd [#allocation6], 4294967040  ;;  %v520_v0 = vmov 0.0   ;;  %vm521_vm0 = vmmov 0   ;;  %v405_v1 = vld [vmem:[#allocation7] sm:$0xff]   ;;  %v61_v2 = vld [vmem:[#allocation2] sm:$0xff]  ;;  %v167_v10 = vlaneseq }
  0x38   :  { %374 = vmatprep.subr.bf16.mxu1 %v520_v0  ;;  %376 = vmatprep.mubr.msk.bf16.mxu1 %vm521_vm0, %v520_v0  ;;  %v62_v3 = vld [vmem:[#allocation2 + $0x8] sm:$0xff]  ;;  %vm69_vm1 = vcmask 130048   ;;  %v202_v5 = vld [vmem:[#allocation2 + $0x10] sm:$0xff]  ;;  %v203_v6 = vld [vmem:[#allocation2 + $0x18] sm:$0xff]  ;;  %v522_v9 = vmov 15   ;;  %s523_s2 = smov [#allocation8]  }
  0x39   :  { %368 = vmatprep.subr.bf16.mxu0 %v520_v0  ;;  %370 = vmatprep.mubr.msk.bf16.mxu0 %vm521_vm0, %v520_v0  ;;  %v63_v4 = vpack.c.bf16 %v62_v3, %v61_v2  ;;  %v406_v7 = vld [vmem:[#allocation5] sm:$0xff]   ;;  %v204_v8 = vpack.c.bf16 %v203_v6, %v202_v5  ;;  %v168_v11 = vshrl.u32 %v167_v10, 7  ;;  %s333_s22 = sshll.u32 %s523_s2, 4  ;;  %s334_s22 = int_to_ptr.vmem [resolvable:$true] %s333_s22 }
  0x3a   :  { %375 = vmatpush3.bf16.msra.mxu1 %v405_v1  ;;  %403 = vset.pattern.permute.xlu0 %v522_v9  ;;  %s485_s23 = scalar_lea.vmem %s334_s22, 1024  ;;  %p490_p11 = scmp.lt.s32.totalorder %s334_s22, %s334_s22 }
  0x3b   :  { %386 = vmatprep.subr.bf16.mxu1 %v520_v0  ;;  %369 = vmatpush3.bf16.msra.mxu0 %v63_v4  ;;  %v169_v19 = vsub.s32 7, %v168_v11  ;;  %p486_p10 = scmp.ne.s32.totalorder %s334_s22, %s485_s23  ;;  %p491_p12 = scmp.lt.s32.totalorder %s485_s23, %s485_s23 }
  0x3c   :  { %380 = vmatprep.subr.bf16.mxu0 %v520_v0  ;;  %404 = vset.pattern.permute.xlu1 %v522_v9 }
  0x3d   :  { %377 = vmatmul.mubr.msk.bf16.vlgmr.msra.gmra.mrb[0].mxu1 %vm69_vm1, %v63_v4  ;;  %p492_p13 = por %p491_p12, %p490_p11 }
  0x3e   :  { %387 = vmatpush3.bf16.msra.mxu1 %v405_v1  ;;  %388 = vmatprep.mubr.msk.bf16.mxu1 %vm521_vm0, %v520_v0 }
  0x3f   :  { %371 = vmatmul.mubr.msk.bf16.vlgmr.msra.gmra.mrb[0].mxu0 %vm69_vm1, %v406_v7  ;;  %p493_p0 = pnand %p492_p13, %p486_p10 }
  0x40   :  { %381 = vmatpush3.bf16.msra.mxu0 %v204_v8  ;;  %382 = vmatprep.mubr.msk.bf16.mxu0 %vm521_vm0, %v520_v0 }
  0x45   :  { %389 = vmatmul.mubr.msk.bf16.vlgmr.msra.gmra.mrb[4].mxu1 %vm69_vm1, %v204_v8 }
  0x47   :  { %383 = vmatmul.mubr.msk.bf16.vlgmr.msra.gmra.mrb[4].mxu0 %vm69_vm1, %v406_v7 }
 0x110   :  { %v157_v12 = vpop.f32.mrb[0].mxu1 }
 0x111   :  { %v378_v13 = vpop.f32.mrb[1].mxu1  ;;  %v178_v14 = vadd.f32 1e-06, %v157_v12  ;;  %v352_v54 = vadd.f32 -0.5, %v157_v12 }
 0x112   :  { %v160_v15 = vpop.f32.mrb[2].mxu1  ;;  %v107_v16 = vpop.f32.mrb[0].mxu0 }
 0x113   :  { %182 = vperm.xlu0 %403, %v178_v14   ;;  %v379_v17 = vpop.f32.mrb[3].mxu1  ;;  %v372_v18 = vpop.f32.mrb[1].mxu0  ;;  %v179_v21 = vadd.f32 1e-06, %v160_v15  ;;  %v350_v37 = vadd.f32 -0.5, %v107_v16  ;;  %v353_v58 = vadd.f32 -0.5, %v160_v15 }
 0x114   :  { %v110_v20 = vpop.f32.mrb[2].mxu0 }
 0x115   :  { %v166_v22 = vadd.f32 1e-06, %v110_v20  ;;  %v373_v23 = vpop.f32.mrb[3].mxu0  ;;  %v351_v38 = vadd.f32 -0.5, %v110_v20 }
 0x117   :  { %187 = vperm.xlu0 %403, %v179_v21   ;;  %v170_v24 = vrot.slane %v166_v22, %v169_v19 }
 0x118   :  { %v283_v25 = vpop.f32.mrb[4].mxu1 }
 0x119   :  { %v390_v26 = vpop.f32.mrb[5].mxu1  ;;  %v304_v27 = vadd.f32 1e-06, %v283_v25  ;;  %407 = vrcp.f32 %v170_v24  ;;  %v358_v62 = vadd.f32 -0.5, %v283_v25 }
 0x11a   :  { %v286_v28 = vpop.f32.mrb[6].mxu1  ;;  %v239_v29 = vpop.f32.mrb[4].mxu0 }
 0x11b   :  { %308 = vperm.xlu1 %404, %v304_v27   ;;  %v391_v30 = vpop.f32.mrb[7].mxu1  ;;  %v384_v31 = vpop.f32.mrb[5].mxu0  ;;  %v305_v33 = vadd.f32 1e-06, %v286_v28  ;;  %v356_v44 = vadd.f32 -0.5, %v239_v29  ;;  %v359_v2 = vadd.f32 -0.5, %v286_v28 }
 0x11c   :  { %v242_v32 = vpop.f32.mrb[6].mxu0 }
 0x11d   :  { %v292_v34 = vadd.f32 1e-06, %v242_v32  ;;  %v385_v35 = vpop.f32.mrb[7].mxu0  ;;  %v357_v45 = vadd.f32 -0.5, %v242_v32 }
 0x11f   :  { %313 = vperm.xlu1 %404, %v305_v33   ;;  %v296_v36 = vrot.slane %v292_v34, %v169_v19 }
 0x121   :  { %409 = vrcp.f32 %v296_v36 }
 0x123   :  { %v408_v39 = vpop.eup %407 }
 0x124   :  { %v172_v40 = vmul.f32 %v408_v39, %v350_v37  ;;  %v173_v41 = vmul.f32 %v408_v39, %v351_v38 }
 0x126   :  { %v174_v42 = vmul.f32 6.2831855, %v172_v40  ;;  %v175_v43 = vmul.f32 6.2831855, %v173_v41 }
 0x128   :  { %196 = vst.msk [vmem:[#allocation8] sm:$0xff] %vm69_vm1, %v174_v42  ;;  %197 = vst.msk [vmem:[#allocation8 + $0x8] sm:$0xff] %vm69_vm1, %v175_v43 }
 0x12b   :  { %v410_v46 = vpop.eup %409 }
 0x12c   :  { %v298_v47 = vmul.f32 %v410_v46, %v356_v44  ;;  %v299_v48 = vmul.f32 %v410_v46, %v357_v45 }
 0x12e   :  { %v300_v49 = vmul.f32 6.2831855, %v298_v47  ;;  %v301_v50 = vmul.f32 6.2831855, %v299_v48 }
 0x130   :  { %323 = vst.msk [vmem:[#allocation8 + $0x20] sm:$0xff] %vm69_vm1, %v300_v49  ;;  %324 = vst.msk [vmem:[#allocation8 + $0x28] sm:$0xff] %vm69_vm1, %v301_v50 }
 0x192   :  { %v183_v51 = vpop.permute.xlu0 %182 }
 0x193   :  { %411 = vrcp.f32 %v183_v51 }
 0x196   :  { %v188_v52 = vpop.permute.xlu0 %187 }
 0x197   :  { %413 = vrcp.f32 %v188_v52 }
 0x19a   :  { %v309_v53 = vpop.permute.xlu1 %308 }
 0x19b   :  { %415 = vrcp.f32 %v309_v53 }
 0x19d   :  { %v412_v55 = vpop.eup %411 }
 0x19e   :  { %v191_v56 = vmul.f32 %v412_v55, %v352_v54  ;;  %v314_v57 = vpop.permute.xlu1 %313 }
 0x19f   :  { %417 = vrcp.f32 %v314_v57 }
 0x1a0   :  { %v194_v59 = vmul.f32 6.2831855, %v191_v56 }
 0x1a1   :  { %v414_v60 = vpop.eup %413 }
 0x1a2   :  { %199 = vst.msk [vmem:[#allocation8 + $0x10] sm:$0xff] %vm69_vm1, %v194_v59  ;;  %v193_v61 = vmul.f32 %v414_v60, %v353_v58 }
 0x1a4   :  { %v195_v63 = vmul.f32 6.2831855, %v193_v61 }
 0x1a5   :  { %v416_v0 = vpop.eup %415 }
 0x1a6   :  { %200 = vst.msk [vmem:[#allocation8 + $0x18] sm:$0xff] %vm69_vm1, %v195_v63  ;;  %v317_v1 = vmul.f32 %v416_v0, %v358_v62 }
 0x1a8   :  { %v320_v3 = vmul.f32 6.2831855, %v317_v1 }
 0x1a9   :  { %v418_v4 = vpop.eup %417 }
 0x1aa   :  { %326 = vst.msk [vmem:[#allocation8 + $0x30] sm:$0xff] %vm69_vm1, %v320_v3  ;;  %v319_v5 = vmul.f32 %v418_v4, %v359_v2 }
 0x1ac   :  { %v321_v6 = vmul.f32 6.2831855, %v319_v5 }
 0x1ae   :  { %327 = vst.msk [vmem:[#allocation8 + $0x38] sm:$0xff] %vm69_vm1, %v321_v6 }
 0x1af   :  { %496 = shalt.err (!%p493_p0)
}
 0x1b0   :  { %s497_s27 = scalar_lea.hbm %s623_s3, 1024 }
 0x1b1   :  { %p498_p1 = scmp.ne.s32.totalorder %s623_s3, %s497_s27  ;;  %p501_p2 = scmp.lt.u32.totalorder %s497_s27, %s623_s3 }
 0x1b3   :  { %p503_p3 = pnand %p501_p2, %p498_p1 }
 0x1b5   :  { %506 = shalt.err (!%p503_p3)
}
 0x1b6   :  { %339 = dma.vmem_to_hbm [thread:$0]  %s334_s22, 1024, %s623_s3, [#allocation4], %s517_s1, %s517_s1, %s518_s9  }
 0x1b7   :  { %511 = dma.done.wait [#allocation4], 1024  }
 0x1b8   :  { %512 = vsyncadd [#allocation4], 4294966272 }
 0x1b9   :  { %343 = vsyncpa [#allocation3], 1 }
 0x1ba   :  { %344 = vsyncpa [#allocation6], 1 }
 0x1bb   :  { %345 = vsyncpa [#allocation4], 1 }

</bundles_post_ra>
